<compile_context>
chip_gen: v7x
topology: tpu7x:2x2x1
jax: 0.10.0
libtpu: 0.0.40
codegen_flags: <defaults>
</compile_context>

<pallas_src>
from functools import partial

import jax
import jax.numpy as jnp
from jax import lax
from jax.experimental import pallas as pl
from jax.experimental.pallas import tpu as pltpu


def _round_up(n: int, m: int) -> int:
    return (n + m - 1) // m * m


def _vmem_limit_bytes() -> int:
    """Scoped-VMEM limit for this kernel: ~half of physical VMEM.
    v5e/v6e (128 MiB physical) -> 64 MiB, v7x (64 MiB) -> 32 MiB."""
    try:
        cap = int(pltpu.get_tpu_info().vmem_capacity_bytes)
    except Exception:  # pragma: no cover - conservative fallback
        cap = 64 * 1024 * 1024
    return max(16 * 1024 * 1024, min(cap // 2, 64 * 1024 * 1024))


def _choose_tile_b(B: int, C: int, x_isz: int, cen_isz: int,
                   vmem_limit: int) -> int:
    """Biggest multiple-of-8 row tile whose pipelined inputs *plus* the f32
    intermediates of the kernel body fit comfortably under the scoped limit."""
    usable = int(vmem_limit * 0.85)          # headroom for compiler scratch
    per_row = (2 * C * x_isz                 # logits, double-buffered
               + 2 * C * cen_isz             # centroids, double-buffered
               + 2 * 128 * 4                 # (TB,1) int32 labels, lane-padded
               + 8 * C * 4)                  # live f32 (TB,C) temporaries
    tb = (usable // per_row) // 8 * 8
    if tb < 8:
        # TODO(synk): add an online-softmax class-tiled path for vocab-scale C.
        raise ValueError(
            f"CE_KL_ENP kernel: C={C} is too large for a full-row tile within "
            f"{vmem_limit} bytes of scoped VMEM; class-axis tiling is not "
            f"implemented.")
    return int(min(tb, 4096, _round_up(B, 8)))


def _ce_kl_enp_kernel(x_ref, lab_ref, cen_ref, out_ref, *, b_total):
    x = x_ref[...].astype(jnp.float32)        # (TB, C) logits (cast in VMEM)
    cen = cen_ref[...].astype(jnp.float32)    # (TB, C) centroid probabilities
    lab = lab_ref[...]                        # (TB, 1) int32 class indices
    tb, c = x.shape

    # --- numerically stable softmax / log-softmax (one exp, one (TB,1) log) --
    m = jnp.max(x, axis=1, keepdims=True)
    xm = x - m
    e = jnp.exp(xm)
    s = jnp.sum(e, axis=1, keepdims=True)
    logs = jnp.log(s)
    p = e * pl.reciprocal(s, approx=False)    # exact recip (ref-level parity)
    logp = xm - logs                          # finite for finite x
    plogp = p * logp                          # shared by KL and entropy terms

    # --- cross entropy:  -logp[i, target_i]  via where-based one-hot --------
    col = lax.broadcasted_iota(jnp.int32, (tb, c), 1)
    ce_rows = -jnp.sum(jnp.where(col == lab, logp, 0.0), axis=1, keepdims=True)

    # --- KL(log_softmax(output) || log(centroids)), log_target form ---------
    #     sum p*(logp - log cen) = sum plogp - sum p*log(cen)
    kl_rows = (jnp.sum(plogp, axis=1, keepdims=True)
               - jnp.sum(p * jnp.log(cen), axis=1, keepdims=True))

    # --- thresholded negative entropy:  sum_c [p >= 1e-10] * p * log p ------
    ne_rows = jnp.sum(jnp.where(p >= 1e-10, plogp, 0.0), axis=1, keepdims=True)

    # --- suppress ragged tail rows of the last tile (garbage data is only ---
    #     row-local, and jnp.where is NaN/Inf-safe) ---------------------------
    row = lax.broadcasted_iota(jnp.int32, (tb, 1), 0) + pl.program_id(0) * tb
    valid = row < b_total
    ce_sum = jnp.sum(jnp.where(valid, ce_rows, 0.0))
    kl_sum = jnp.sum(jnp.where(valid, kl_rows, 0.0))
    ne_sum = jnp.sum(jnp.where(valid, ne_rows, 0.0))

    # --- lane-dense (8,128) partial-sum slab: row 0 = [ce, kl, nent, 0...] ---
    r = lax.broadcasted_iota(jnp.int32, (8, 128), 0)
    l = lax.broadcasted_iota(jnp.int32, (8, 128), 1)
    slab = jnp.where((r == 0) & (l == 0), ce_sum,
           jnp.where((r == 0) & (l == 1), kl_sum,
           jnp.where((r == 0) & (l == 2), ne_sum, jnp.float32(0.0))))
    out_ref[...] = slab.reshape(1, 8, 128)


def ce_kl_enp_loss(output, target, centroids):
    """output: (B, C) logits (f32 or bf16); target: (B,) int; centroids: (B, C)
    (f32 or bf16).  Returns (3,) float32 [ce_loss, kl_surrogate, -mean(entropy)]."""
    B, C = output.shape
    assert centroids.shape == (B, C)

    vmem_limit = _vmem_limit_bytes()
    TB = _choose_tile_b(B, C,
                        jnp.dtype(output.dtype).itemsize,
                        jnp.dtype(centroids.dtype).itemsize,
                        vmem_limit)
    T = -(-B // TB)                           # ceil-div: no operand padding

    lab = target.astype(jnp.int32).reshape(B, 1)
    kernel = partial(_ce_kl_enp_kernel, b_total=B)

    partials = pl.pallas_call(
        kernel,
        out_shape=jax.ShapeDtypeStruct((T, 8, 128), jnp.float32),
        grid=(T,),
        in_specs=[
            pl.BlockSpec((TB, C), lambda i: (i, 0)),
            pl.BlockSpec((TB, 1), lambda i: (i, 0)),
            pl.BlockSpec((TB, C), lambda i: (i, 0)),
        ],
        out_specs=pl.BlockSpec((1, 8, 128), lambda i: (i, 0, 0)),
        compiler_params=pltpu.CompilerParams(
            dimension_semantics=("parallel",),
            vmem_limit_bytes=int(vmem_limit)),
    )(output, lab, centroids)

    sums = jnp.sum(partials, axis=(0, 1))     # (128,): [ce, kl, nent, 0, ...]
    inv_b = jnp.float32(1.0 / B)
    return jnp.stack([sums[0] * inv_b, sums[1] * inv_b, sums[2] * inv_b])


def _reference(output, target, centroids):
    # Pure-JAX mirror of the PyTorch forward.
    x = output.astype(jnp.float32)
    c = centroids.astype(jnp.float32)
    B = x.shape[0]
    logp = jax.nn.log_softmax(x, axis=1)
    p = jax.nn.softmax(x, axis=1)
    ce = -jnp.mean(logp[jnp.arange(B), target])
    kl = jnp.sum(p * (logp - jnp.log(c))) / B
    prob1 = jnp.where(p < 1e-10, 1.0, p)
    prob2 = jnp.where(p < 1e-10, 0.0, p)
    entropy = -jnp.sum(prob2 * jnp.log(prob1), axis=1)
    return jnp.stack([ce, kl, -jnp.mean(entropy)])


if __name__ == "__main__":
    key = jax.random.PRNGKey(0)

    # --- case 1: tile-aligned B, lane-dense C, f32 logits --------------------
    k1, k2, k3 = jax.random.split(key, 3)
    B, C = 16, 128
    output = jax.random.normal(k1, (B, C), dtype=jnp.float32)
    target = jax.random.randint(k2, (B,), 0, C, dtype=jnp.int32)
    centroids = jax.nn.softmax(jax.random.normal(k3, (B, C), dtype=jnp.float32),
                               axis=1)
    got = jax.block_until_ready(ce_kl_enp_loss(output, target, centroids))
    ref = jax.block_until_ready(_reference(output, target, centroids))
    assert jnp.allclose(got, ref, rtol=1e-5, atol=1e-5), (got, ref)

    # --- case 2: ragged batch (un-padded tail rows) + non-128 class count ---
    k4, k5, k6 = jax.random.split(jax.random.PRNGKey(0), 3)
    B2, C2 = 10, 64
    output2 = jax.random.normal(k4, (B2, C2), dtype=jnp.float32)
    target2 = jax.random.randint(k5, (B2,), 0, C2, dtype=jnp.int32)
    centroids2 = jax.nn.softmax(jax.random.normal(k6, (B2, C2),
                                                  dtype=jnp.float32), axis=1)
    got2 = jax.block_until_ready(ce_kl_enp_loss(output2, target2, centroids2))
    ref2 = jax.block_until_ready(_reference(output2, target2, centroids2))
    assert jnp.allclose(got2, ref2, rtol=1e-5, atol=1e-5), (got2, ref2)

    # --- case 3: bf16 logits AND bf16 centroids fed natively ----------------
    output_bf16 = output.astype(jnp.bfloat16)
    centroids_bf16 = centroids.astype(jnp.bfloat16)
    got3 = jax.block_until_ready(
        ce_kl_enp_loss(output_bf16, target, centroids_bf16))
    ref3 = jax.block_until_ready(
        _reference(output_bf16, target, centroids_bf16))
    assert jnp.allclose(got3, ref3, rtol=1e-5, atol=1e-5), (got3, ref3)

    print("KERNEL_OK")
</pallas_src>

<mosaic_0001>
module attributes {stable_mosaic.version = 11 : i64} {
  func.func @_ce_kl_enp_kernel(%arg0: i32, %arg1: memref<16x128xf32, #tpu.memory_space<vmem>>, %arg2: memref<16x1xi32, #tpu.memory_space<vmem>>, %arg3: memref<16x128xf32, #tpu.memory_space<vmem>>, %arg4: memref<1x8x128xf32, #tpu.memory_space<vmem>>) attributes {dimension_semantics = [#tpu.dimension_semantics<parallel>], iteration_bounds = array<i64: 1>, scalar_prefetch = 0 : i64, scratch_operands = 0 : i64, tpu.core_type = #tpu.core_type<tc>, window_params = [{transform_indices = @transform_0, window_bounds = array<i64: 16, 128>}, {transform_indices = @transform_1, window_bounds = array<i64: 16, 1>}, {transform_indices = @transform_2, window_bounds = array<i64: 16, 128>}, {transform_indices = @transform_3, window_bounds = array<i64: 1, 8, 128>}]} {
    %c0 = arith.constant 0 : index
    %c0_0 = arith.constant 0 : index
    %0 = vector.load %arg1[%c0, %c0_0] : memref<16x128xf32, #tpu.memory_space<vmem>>, vector<16x128xf32>
    %c0_1 = arith.constant 0 : index
    %c0_2 = arith.constant 0 : index
    %1 = vector.load %arg3[%c0_1, %c0_2] : memref<16x128xf32, #tpu.memory_space<vmem>>, vector<16x128xf32>
    %c0_3 = arith.constant 0 : index
    %c0_4 = arith.constant 0 : index
    %2 = vector.load %arg2[%c0_3, %c0_4] : memref<16x1xi32, #tpu.memory_space<vmem>>, vector<16x1xi32>
    %cst = arith.constant dense<0xFF800000> : vector<16xf32>
    %3 = vector.multi_reduction <maximumf>, %0, %cst [1] : vector<16x128xf32> to vector<16xf32>
    %4 = vector.shape_cast %3 : vector<16xf32> to vector<16x1xf32>
    %5 = vector.broadcast %4 : vector<16x1xf32> to vector<16x128xf32>
    %6 = arith.subf %0, %5 : vector<16x128xf32>
    %7 = math.exp %6 : vector<16x128xf32>
    %cst_5 = arith.constant dense<0.000000e+00> : vector<16xf32>
    %8 = vector.multi_reduction <add>, %7, %cst_5 [1] : vector<16x128xf32> to vector<16xf32>
    %9 = vector.shape_cast %8 : vector<16xf32> to vector<16x1xf32>
    %10 = math.log %9 : vector<16x1xf32>
    %11 = tpu.reciprocal %9 : vector<16x1xf32> -> vector<16x1xf32>
    %12 = vector.broadcast %11 : vector<16x1xf32> to vector<16x128xf32>
    %13 = arith.mulf %7, %12 : vector<16x128xf32>
    %14 = vector.broadcast %10 : vector<16x1xf32> to vector<16x128xf32>
    %15 = arith.subf %6, %14 : vector<16x128xf32>
    %16 = arith.mulf %13, %15 : vector<16x128xf32>
    %17 = tpu.iota {dimensions = array<i32: 1>} : vector<16x128xi32>
    %18 = vector.broadcast %2 : vector<16x1xi32> to vector<16x128xi32>
    %19 = arith.cmpi eq, %17, %18 : vector<16x128xi32>
    %cst_6 = arith.constant 0.000000e+00 : f32
    %20 = vector.broadcast %cst_6 : f32 to vector<16x128xf32>
    %21 = arith.select %19, %15, %20 : vector<16x128xi1>, vector<16x128xf32>
    %cst_7 = arith.constant dense<0.000000e+00> : vector<16xf32>
    %22 = vector.multi_reduction <add>, %21, %cst_7 [1] : vector<16x128xf32> to vector<16xf32>
    %23 = vector.shape_cast %22 : vector<16xf32> to vector<16x1xf32>
    %cst_8 = arith.constant 0.000000e+00 : f32
    %24 = vector.broadcast %cst_8 : f32 to vector<16x1xf32>
    %25 = arith.subf %24, %23 : vector<16x1xf32>
    %cst_9 = arith.constant dense<0.000000e+00> : vector<16xf32>
    %26 = vector.multi_reduction <add>, %16, %cst_9 [1] : vector<16x128xf32> to vector<16xf32>
    %27 = vector.shape_cast %26 : vector<16xf32> to vector<16x1xf32>
    %28 = math.log %1 : vector<16x128xf32>
    %29 = arith.mulf %13, %28 : vector<16x128xf32>
    %cst_10 = arith.constant dense<0.000000e+00> : vector<16xf32>
    %30 = vector.multi_reduction <add>, %29, %cst_10 [1] : vector<16x128xf32> to vector<16xf32>
    %31 = vector.shape_cast %30 : vector<16xf32> to vector<16x1xf32>
    %32 = arith.subf %27, %31 : vector<16x1xf32>
    %cst_11 = arith.constant 1.000000e-10 : f32
    %33 = vector.broadcast %cst_11 : f32 to vector<16x128xf32>
    %34 = arith.cmpf oge, %13, %33 : vector<16x128xf32>
    %cst_12 = arith.constant 0.000000e+00 : f32
    %35 = vector.broadcast %cst_12 : f32 to vector<16x128xf32>
    %36 = arith.select %34, %16, %35 : vector<16x128xi1>, vector<16x128xf32>
    %cst_13 = arith.constant dense<0.000000e+00> : vector<16xf32>
    %37 = vector.multi_reduction <add>, %36, %cst_13 [1] : vector<16x128xf32> to vector<16xf32>
    %38 = vector.shape_cast %37 : vector<16xf32> to vector<16x1xf32>
    %39 = tpu.iota {dimensions = array<i32: 0>} : vector<16x1xi32>
    %c16_i32 = arith.constant 16 : i32
    %40 = arith.muli %arg0, %c16_i32 : i32
    %41 = vector.broadcast %40 : i32 to vector<16x1xi32>
    %42 = arith.addi %39, %41 : vector<16x1xi32>
    %c16_i32_14 = arith.constant 16 : i32
    %43 = vector.broadcast %c16_i32_14 : i32 to vector<16x1xi32>
    %44 = arith.cmpi slt, %42, %43 : vector<16x1xi32>
    %cst_15 = arith.constant 0.000000e+00 : f32
    %45 = vector.broadcast %cst_15 : f32 to vector<16x1xf32>
    %46 = arith.select %44, %25, %45 : vector<16x1xi1>, vector<16x1xf32>
    %47 = vector.shape_cast %46 : vector<16x1xf32> to vector<1x16x1xf32>
    %cst_16 = arith.constant dense<0.000000e+00> : vector<1xf32>
    %48 = vector.multi_reduction <add>, %47, %cst_16 [1, 2] : vector<1x16x1xf32> to vector<1xf32>
    %49 = vector.shape_cast %48 : vector<1xf32> to vector<1x1x1xf32>
    %50 = vector.extract %49[0, 0, 0] : f32 from vector<1x1x1xf32>
    %cst_17 = arith.constant 0.000000e+00 : f32
    %51 = vector.broadcast %cst_17 : f32 to vector<16x1xf32>
    %52 = arith.select %44, %32, %51 : vector<16x1xi1>, vector<16x1xf32>
    %53 = vector.shape_cast %52 : vector<16x1xf32> to vector<1x16x1xf32>
    %cst_18 = arith.constant dense<0.000000e+00> : vector<1xf32>
    %54 = vector.multi_reduction <add>, %53, %cst_18 [1, 2] : vector<1x16x1xf32> to vector<1xf32>
    %55 = vector.shape_cast %54 : vector<1xf32> to vector<1x1x1xf32>
    %56 = vector.extract %55[0, 0, 0] : f32 from vector<1x1x1xf32>
    %cst_19 = arith.constant 0.000000e+00 : f32
    %57 = vector.broadcast %cst_19 : f32 to vector<16x1xf32>
    %58 = arith.select %44, %38, %57 : vector<16x1xi1>, vector<16x1xf32>
    %59 = vector.shape_cast %58 : vector<16x1xf32> to vector<1x16x1xf32>
    %cst_20 = arith.constant dense<0.000000e+00> : vector<1xf32>
    %60 = vector.multi_reduction <add>, %59, %cst_20 [1, 2] : vector<1x16x1xf32> to vector<1xf32>
    %61 = vector.shape_cast %60 : vector<1xf32> to vector<1x1x1xf32>
    %62 = vector.extract %61[0, 0, 0] : f32 from vector<1x1x1xf32>
    %63 = tpu.iota {dimensions = array<i32: 0>} : vector<8x128xi32>
    %64 = tpu.iota {dimensions = array<i32: 1>} : vector<8x128xi32>
    %c0_i32 = arith.constant 0 : i32
    %65 = vector.broadcast %c0_i32 : i32 to vector<8x128xi32>
    %66 = arith.cmpi eq, %63, %65 : vector<8x128xi32>
    %c0_i32_21 = arith.constant 0 : i32
    %67 = vector.broadcast %c0_i32_21 : i32 to vector<8x128xi32>
    %68 = arith.cmpi eq, %64, %67 : vector<8x128xi32>
    %69 = arith.andi %66, %68 : vector<8x128xi1>
    %c0_i32_22 = arith.constant 0 : i32
    %70 = vector.broadcast %c0_i32_22 : i32 to vector<8x128xi32>
    %71 = arith.cmpi eq, %63, %70 : vector<8x128xi32>
    %c1_i32 = arith.constant 1 : i32
    %72 = vector.broadcast %c1_i32 : i32 to vector<8x128xi32>
    %73 = arith.cmpi eq, %64, %72 : vector<8x128xi32>
    %74 = arith.andi %71, %73 : vector<8x128xi1>
    %c0_i32_23 = arith.constant 0 : i32
    %75 = vector.broadcast %c0_i32_23 : i32 to vector<8x128xi32>
    %76 = arith.cmpi eq, %63, %75 : vector<8x128xi32>
    %c2_i32 = arith.constant 2 : i32
    %77 = vector.broadcast %c2_i32 : i32 to vector<8x128xi32>
    %78 = arith.cmpi eq, %64, %77 : vector<8x128xi32>
    %79 = arith.andi %76, %78 : vector<8x128xi1>
    %cst_24 = arith.constant 0.000000e+00 : f32
    %80 = vector.broadcast %62 : f32 to vector<8x128xf32>
    %81 = vector.broadcast %cst_24 : f32 to vector<8x128xf32>
    %82 = arith.select %79, %80, %81 : vector<8x128xi1>, vector<8x128xf32>
    %83 = vector.broadcast %56 : f32 to vector<8x128xf32>
    %84 = arith.select %74, %83, %82 : vector<8x128xi1>, vector<8x128xf32>
    %85 = vector.broadcast %50 : f32 to vector<8x128xf32>
    %86 = arith.select %69, %85, %84 : vector<8x128xi1>, vector<8x128xf32>
    %87 = vector.shape_cast %86 : vector<8x128xf32> to vector<1x8x128xf32>
    %c0_25 = arith.constant 0 : index
    %c0_26 = arith.constant 0 : index
    %c0_27 = arith.constant 0 : index
    %88 = vector.load %arg4[%c0_25, %c0_26, %c0_27] : memref<1x8x128xf32, #tpu.memory_space<vmem>>, vector<1x8x128xf32>
    tpu.vector_store %arg4[%c0_25, %c0_26, %c0_27], %87 {strides = array<i32>} : memref<1x8x128xf32, #tpu.memory_space<vmem>>, vector<1x8x128xf32>,
    return
  }
  func.func @transform_0(%arg0: i32) -> (i32, i32) {
    %c0_i32 = arith.constant 0 : i32
    %c0_i32_0 = arith.constant 0 : i32
    return %arg0, %c0_i32 : i32, i32
  }
  func.func @transform_1(%arg0: i32) -> (i32, i32) {
    %c0_i32 = arith.constant 0 : i32
    %c0_i32_0 = arith.constant 0 : i32
    return %arg0, %c0_i32 : i32, i32
  }
  func.func @transform_2(%arg0: i32) -> (i32, i32) {
    %c0_i32 = arith.constant 0 : i32
    %c0_i32_0 = arith.constant 0 : i32
    return %arg0, %c0_i32 : i32, i32
  }
  func.func @transform_3(%arg0: i32) -> (i32, i32, i32) {
    %c0_i32 = arith.constant 0 : i32
    %c0_i32_0 = arith.constant 0 : i32
    %c0_i32_1 = arith.constant 0 : i32
    return %arg0, %c0_i32, %c0_i32_0 : i32, i32, i32
  }
}

</mosaic_0001>

<bundles_post_ra>
// kernel: tpu_custom_call.1
= control target key start
LH: loop header
LB: loop body
LE: loop exit
PB: predicated region body
PF: predicated region fallthrough
CT: control target
= control target key end

     0   :  { %8 = vsyncpa [#allocation3], 0  ;;  %s337_s0 = inlined_call_operand.vmem [shape: f32[16,128], index: 0, kind: input, shape index: {}]   ;;  %s338_s1 = inlined_call_operand.vmem [shape: s32[16,1], index: 1, kind: input, shape index: {}]   ;;  %s339_s2 = inlined_call_operand.hbm [shape: f32[16,128], index: 2, kind: input, shape index: {}]   ;;  %s340_s3 = inlined_call_operand.hbm [shape: f32[1,8,128], index: 3, kind: output, shape index: {}]  }
   0x1   :  { %9 = vsyncpa [#allocation4], 0  ;;  %s261_s12 = smov [#allocation2]   ;;  %s213_s16 = scalar_lea.hbm %s339_s2, 256 }
   0x2   :  { %s19_s13 = sshll.u32 %s261_s12, 4  ;;  %p214_p0 = scmp.ne.s32.totalorder %s339_s2, %s213_s16  ;;  %s20_s13 = int_to_ptr.vmem [resolvable:$true] %s19_s13 }
   0x3   :  { %p217_p1 = scmp.lt.u32.totalorder %s213_s16, %s339_s2 }
   0x5   :  { %p219_p2 = pnand %p217_p1, %p214_p0 }
   0x7   :  { %222 = shalt.err (!%p219_p2)
}
   0x8   :  { %s223_s21 = scalar_lea.vmem %s20_s13, 256  ;;  %p228_p4 = scmp.lt.s32.totalorder %s20_s13, %s20_s13 }
   0x9   :  { %p224_p3 = scmp.ne.s32.totalorder %s20_s13, %s223_s21  ;;  %p229_p5 = scmp.lt.s32.totalorder %s223_s21, %s223_s21 }
   0xb   :  { %p230_p6 = por %p229_p5, %p228_p4 }
   0xd   :  { %p231_p7 = pnand %p230_p6, %p224_p3 }
   0xf   :  { %234 = shalt.err (!%p231_p7)
}
  0x10   :  { %s262_s22 = smov 128   ;;  %s263_s23 = smov 8  }
  0x11   :  { %25 = dma.hbm_to_vmem [thread:$0]  %s339_s2, 256, %s20_s13, [#allocation3], %s262_s22, %s262_s22, %s263_s23  }
  0x12   :  { %257 = dma.done.wait [#allocation3], 256  }
  0x13   :  { %258 = vsyncadd [#allocation3], 4294967040  ;;  %v29_v0 = vld [vmem:[%s337_s0] sm:$0xff]  ;;  %v30_v1 = vld [vmem:[%s337_s0 + $0x8] sm:$0xff]  ;;  %v264_v3 = vmov 0   ;;  %v61_v17 = vlaneseq  ;;  %vm114_vm4 = vcmask 7168  }
  0x14   :  { %35 = vmax.xlane.f32.xlu0 %v29_v0  ;;  %v33_v2 = vld [vmem:[%s338_s1] sm:$0xff]  ;;  %196 = vset.pattern.permute.xlu1 %v264_v3  ;;  %v34_v12 = vld [vmem:[%s338_s1 + $0x8] sm:$0xff]  ;;  %s265_s7 = smov [#allocation5]  }
  0x15   :  { %195 = vset.pattern.permute.xlu0 %v264_v3  ;;  %v31_v13 = vld [vmem:[#allocation2] sm:$0xff]  ;;  %v32_v15 = vld [vmem:[#allocation2 + $0x8] sm:$0xff]  ;;  %v311_v18 = vand.u32 127, %v61_v17  ;;  %s175_s8 = sshll.u32 %s265_s7, 4  ;;  %s176_s8 = int_to_ptr.vmem [resolvable:$true] %s175_s8 }
  0x16   :  { %s235_s9 = scalar_lea.vmem %s176_s8, 128  ;;  %p240_p9 = scmp.lt.s32.totalorder %s176_s8, %s176_s8 }
  0x17   :  { %vm160_vm6 = vcmp.eq.s32.totalorder %v311_v18, 2  ;;  %vm158_vm7 = vcmp.eq.s32.totalorder %v311_v18, 1  ;;  %vm156_vm8 = vcmp.eq.s32.totalorder %v311_v18, 0  ;;  %p236_p8 = scmp.ne.s32.totalorder %s176_s8, %s235_s9  ;;  %p241_p10 = scmp.lt.s32.totalorder %s235_s9, %s235_s9 }
  0x18   :  { %37 = vmax.xlane.f32.xlu0 %v30_v1 }
  0x19   :  { %p242_p11 = por %p241_p10, %p240_p9 }
  0x1b   :  { %p243_p12 = pnand %p242_p11, %p236_p8 }
  0x2e   :  { %64 = vperm.xlu0 %195, %v33_v2  }
  0xa1   :  { %v36_v4 = vpop.xlane.xlu0 %35 }
  0xa2   :  { %v39_v5 = vsub.f32 %v29_v0, %v36_v4 }
  0xa4   :  { %v41_v6 = vmul.f32 1.442695, %v39_v5 }
  0xa5   :  { %v38_v7 = vpop.xlane.xlu0 %37 }
  0xa6   :  { %197 = vpow2.f32 %v41_v6  ;;  %v40_v8 = vsub.f32 %v30_v1, %v38_v7 }
  0xa8   :  { %v43_v9 = vmul.f32 1.442695, %v40_v8 }
  0xaa   :  { %199 = vpow2.f32 %v43_v9 }
  0xab   :  { %201 = vlog2.f32 %v31_v13 }
  0xad   :  { %v65_v20 = vpop.permute.xlu0 %64 }
  0xae   :  { %vm69_vm0 = vcmp.eq.s32.totalorder %v311_v18, %v65_v20 }
  0xb0   :  { %v198_v10 = vpop.eup %197 }
  0xb1   :  { %45 = vadd.xlane.f32.xlu1 %v198_v10 }
  0xb4   :  { %v200_v11 = vpop.eup %199 }
  0xb5   :  { %47 = vadd.xlane.f32.xlu1 %v200_v11  ;;  %v202_v19 = vpop.eup %201 }
  0xb6   :  { %v84_v29 = vmul.f32 0.6931472, %v202_v19 }
  0xc6   :  { %67 = vperm.xlu1 %196, %v34_v12  }
 0x13e   :  { %v46_v14 = vpop.xlane.xlu1 %45 }
 0x13f   :  { %203 = vlog2.f32 %v46_v14 }
 0x140   :  { %205 = vrcp.f32 %v46_v14 }
 0x141   :  { %207 = vlog2.f32 %v32_v15 }
 0x142   :  { %v48_v16 = vpop.xlane.xlu1 %47 }
 0x143   :  { %209 = vlog2.f32 %v48_v16 }
 0x144   :  { %211 = vrcp.f32 %v48_v16 }
 0x146   :  { %v68_v26 = vpop.permute.xlu1 %67 }
 0x147   :  { %vm70_vm1 = vcmp.eq.s32.totalorder %v311_v18, %v68_v26 }
 0x149   :  { %v204_v21 = vpop.eup %203 }
 0x14a   :  { %v206_v22 = vpop.eup %205  ;;  %v50_v23 = vmul.f32 0.6931472, %v204_v21 }
 0x14b   :  { %v208_v24 = vpop.eup %207  ;;  %v55_v28 = vmul.f32 %v206_v22, %v198_v10 }
 0x14c   :  { %v57_v25 = vsub.f32 %v39_v5, %v50_v23  ;;  %v86_v36 = vmul.f32 0.6931472, %v208_v24  ;;  %v104_v23 = vshrl.u32 %v61_v17, 7 }
 0x14d   :  { %v210_v27 = vpop.eup %209  ;;  %v87_v34 = vmul.f32 %v84_v29, %v55_v28  ;;  %vm95_vm2 = vcmp.ge.f32.partialorder %v55_v28, 1e-10 }
 0x14e   :  { %v212_v30 = vpop.eup %211  ;;  %v71_v31 = vsel %vm69_vm0, %v57_v25, 0.0  ;;  %v52_v32 = vmul.f32 0.6931472, %v210_v27  ;;  %v59_v39 = vmul.f32 %v57_v25, %v55_v28  ;;  %vm155_vm5 = vcmp.eq.s32.totalorder %v104_v23, 0 }
 0x14f   :  { %73 = vadd.xlane.f32.xlu1 %v71_v31  ;;  %v56_v35 = vmul.f32 %v212_v30, %v200_v11  ;;  %vm161_vm9 = vmand %vm155_vm5, %vm160_vm6 }
 0x150   :  { %v58_v33 = vsub.f32 %v40_v8, %v52_v32  ;;  %v97_v41 = vsel %vm95_vm2, %v59_v39, 0.0  ;;  %vm159_vm10 = vmand %vm155_vm5, %vm158_vm7 }
 0x151   :  { %v88_v38 = vmul.f32 %v86_v36, %v56_v35  ;;  %vm96_vm3 = vcmp.ge.f32.partialorder %v56_v35, 1e-10  ;;  %vm157_vm11 = vmand %vm155_vm5, %vm156_vm8 }
 0x152   :  { %v72_v37 = vsel %vm70_vm1, %v58_v33, 0.0  ;;  %v60_v40 = vmul.f32 %v58_v33, %v56_v35 }
 0x153   :  { %75 = vadd.xlane.f32.xlu0 %v72_v37  ;;  %89 = vadd.xlane.f32.xlu1 %v87_v34 }
 0x154   :  { %v98_v42 = vsel %vm96_vm3, %v60_v40, 0.0 }
 0x157   :  { %91 = vadd.xlane.f32.xlu1 %v88_v38 }
 0x15b   :  { %79 = vadd.xlane.f32.xlu1 %v59_v39 }
 0x15f   :  { %81 = vadd.xlane.f32.xlu1 %v60_v40 }
 0x163   :  { %99 = vadd.xlane.f32.xlu1 %v97_v41 }
 0x167   :  { %101 = vadd.xlane.f32.xlu1 %v98_v42 }
 0x1dc   :  { %v74_v43 = vpop.xlane.xlu1 %73 }
 0x1dd   :  { %v77_v44 = vsub.f32 0.0, %v74_v43 }
 0x1df   :  { %v115_v48 = vsel %vm114_vm4, %v77_v44, 0.0 }
 0x1e0   :  { %v90_v45 = vpop.xlane.xlu1 %89  ;;  %v76_v46 = vpop.xlane.xlu0 %75 }
 0x1e1   :  { %v78_v47 = vsub.f32 0.0, %v76_v46 }
 0x1e3   :  { %v116_v49 = vsel %vm114_vm4, %v78_v47, 0.0 }
 0x1e4   :  { %v92_v50 = vpop.xlane.xlu1 %91  ;;  %v117_v51 = vadd.f32 %v116_v49, %v115_v48 }
 0x1e6   :  { %118 = vadd.xlane.f32.xlu0 %v117_v51 }
 0x1e8   :  { %v80_v52 = vpop.xlane.xlu1 %79 }
 0x1e9   :  { %v93_v53 = vsub.f32 %v80_v52, %v90_v45 }
 0x1eb   :  { %v129_v56 = vsel %vm114_vm4, %v93_v53, 0.0 }
 0x1ec   :  { %v82_v54 = vpop.xlane.xlu1 %81 }
 0x1ed   :  { %v94_v55 = vsub.f32 %v82_v54, %v92_v50 }
 0x1ef   :  { %v130_v57 = vsel %vm114_vm4, %v94_v55, 0.0 }
 0x1f0   :  { %v100_v58 = vpop.xlane.xlu1 %99  ;;  %v131_v59 = vadd.f32 %v130_v57, %v129_v56 }
 0x1f1   :  { %v143_v61 = vsel %vm114_vm4, %v100_v58, 0.0 }
 0x1f2   :  { %132 = vadd.xlane.f32.xlu1 %v131_v59 }
 0x1f4   :  { %v102_v60 = vpop.xlane.xlu1 %101 }
 0x1f5   :  { %v144_v62 = vsel %vm114_vm4, %v102_v60, 0.0 }
 0x1f6   :  { %v145_v63 = vadd.f32 %v144_v62, %v143_v61 }
 0x1f8   :  { %146 = vadd.xlane.f32.xlu0 %v145_v63 }
 0x273   :  { %v119_v0 = vpop.xlane.xlu0 %118 }
 0x274   :  { %v120_v1 = vrot.slane %v119_v0, 4 }
 0x276   :  { %v121_v2 = vadd.f32 %v120_v1, %v119_v0 }
 0x278   :  { %v122_v3 = vrot.slane %v121_v2, 2 }
 0x27a   :  { %v123_v4 = vadd.f32 %v122_v3, %v121_v2 }
 0x27c   :  { %v124_v5 = vrot.slane %v123_v4, 1 }
 0x27e   :  { %v125_v6 = vadd.f32 %v124_v5, %v123_v4 }
 0x27f   :  { %v133_v7 = vpop.xlane.xlu1 %132 }
 0x280   :  { %v134_v8 = vrot.slane %v133_v7, 4  ;;  %184 = vpush %v125_v6 }
 0x282   :  { %v135_v9 = vadd.f32 %v134_v8, %v133_v7 }
 0x284   :  { %v136_v10 = vrot.slane %v135_v9, 2 }
 0x285   :  { %v147_v11 = vpop.xlane.xlu0 %146 }
 0x286   :  { %v137_v12 = vadd.f32 %v136_v10, %v135_v9  ;;  %v148_v13 = vrot.slane %v147_v11, 4 }
 0x288   :  { %v149_v14 = vadd.f32 %v148_v13, %v147_v11  ;;  %v138_v15 = vrot.slane %v137_v12, 1 }
 0x28a   :  { %v150_v16 = vrot.slane %v149_v14, 2  ;;  %v139_v19 = vadd.f32 %v138_v15, %v137_v12 }
 0x28c   :  { %v151_v20 = vadd.f32 %v150_v16, %v149_v14  ;;  %186 = vpush %v139_v19 }
 0x28e   :  { %v152_v21 = vrot.slane %v151_v20, 1 }
 0x290   :  { %v153_v22 = vadd.f32 %v152_v21, %v151_v20 }
 0x292   :  { %188 = vpush %v153_v22 }
 0x2b1   :  { %s185_s1 = spop %184 }
 0x2b2   :  { %v166_v27 = vstv %s185_s1 }
 0x2bd   :  { %s187_s5 = spop %186 }
 0x2be   :  { %v164_v25 = vstv %s187_s5 }
 0x2c3   :  { %s189_s6 = spop %188 }
 0x2c4   :  { %v162_v24 = vstv %s189_s6 }
 0x2c5   :  { %v163_v26 = vsel %vm161_vm9, %v162_v24, 0.0 }
 0x2c6   :  { %v165_v17 = vsel %vm159_vm10, %v164_v25, %v163_v26 }
 0x2c7   :  { %v167_v28 = vsel %vm157_vm11, %v166_v27, %v165_v17 }
 0x2c8   :  { %168 = vst [vmem:[#allocation5] sm:$0xff] %v167_v28 }
 0x2c9   :  { %246 = shalt.err (!%p243_p12)
}
 0x2ca   :  { %s247_s12 = scalar_lea.hbm %s340_s3, 128 }
 0x2cb   :  { %p248_p13 = scmp.ne.s32.totalorder %s340_s3, %s247_s12  ;;  %p251_p0 = scmp.lt.u32.totalorder %s247_s12, %s340_s3 }
 0x2cd   :  { %p253_p1 = pnand %p251_p0, %p248_p13 }
 0x2cf   :  { %256 = shalt.err (!%p253_p1)
}
 0x2d0   :  { %178 = dma.vmem_to_hbm [thread:$0]  %s176_s8, 128, %s340_s3, [#allocation4]  }
 0x2d1   :  { %259 = dma.done.wait [#allocation4], 128  }
 0x2d2   :  { %260 = vsyncadd [#allocation4], 4294967168 }
 0x2d3   :  { %182 = vsyncpa [#allocation3], 1 }
 0x2d4   :  { %183 = vsyncpa [#allocation4], 1 }

</bundles_post_ra>
